<compile_context>
chip_gen: v7x
topology: tpu7x:2x2x1
jax: 0.10.0
libtpu: 0.0.40
codegen_flags: <defaults>
</compile_context>

<pallas_src>
import math

import jax
import jax.numpy as jnp
from jax import lax
from jax.experimental import pallas as pl
from jax.experimental.pallas import tpu as pltpu


def _make_mha_kernel(has_mask: bool, compute_dtype, norm: float):
    cdt = jnp.dtype(compute_dtype)
    is_bf16 = cdt == jnp.dtype(jnp.bfloat16)
    approx_recip = is_bf16
    exp_dtype = jnp.bfloat16 if is_bf16 else jnp.float32   # bf16 EUP on v6e/v7x

    def kernel(*refs):
        if has_mask:
            (qp_ref, kp_ref, vp_ref, mask_ref, wo_ref, o_ref,
             m_scr, l_scr, acc_scr, out_scr) = refs
        else:
            (qp_ref, kp_ref, vp_ref, wo_ref, o_ref,
             m_scr, l_scr, acc_scr, out_scr) = refs
            mask_ref = None

        h = pl.program_id(2)
        kv = pl.program_id(3)
        num_heads = pl.num_programs(2)
        num_kv = pl.num_programs(3)

        # ---- per-(b, q-tile, head) init of the online-softmax state ----
        @pl.when(kv == 0)
        def _():
            m_scr[...] = jnp.full_like(m_scr, -1e30)
            l_scr[...] = jnp.zeros_like(l_scr)
            acc_scr[...] = jnp.zeros_like(acc_scr)

        # ---- per-(b, q-tile) init of the fused W_out output accumulator ----
        @pl.when((kv == 0) & (h == 0))
        def _():
            out_scr[...] = jnp.zeros_like(out_scr)

        # ---- scores: contract key_dim of both operands (no explicit K^T) ----
        s = lax.dot_general(qp_ref[...], kp_ref[...],
                            dimension_numbers=(((1,), (1,)), ((), ())),
                            preferred_element_type=jnp.float32)      # (tq, tk)
        s = s * norm      # scale the f32 scores (matches the torch reference rounding)

        if has_mask:
            masked = mask_ref[...] != 0
            s = jnp.where(masked, -1e30, s)

        # ---- online softmax update ----
        m_prev = m_scr[...]
        m_new = jnp.maximum(m_prev, jnp.max(s, axis=-1, keepdims=True))
        alpha = jnp.exp(m_prev - m_new)                       # (tq, 1), f32 (cheap)
        p = jnp.exp((s - m_new).astype(exp_dtype))            # bf16 exp on fast path
        if has_mask:
            # exact zeros, like exp(-inf); also makes fully-masked rows give l == 0
            p = jnp.where(masked, jnp.zeros_like(p), p)

        l_scr[...] = alpha * l_scr[...] + jnp.sum(p, axis=-1, keepdims=True,
                                                  dtype=jnp.float32)
        acc_scr[...] = alpha * acc_scr[...] + jnp.dot(
            p.astype(compute_dtype), vp_ref[...], preferred_element_type=jnp.float32)
        m_scr[...] = m_new

        # ---- last K tile of this head: normalize and fold through W_out ----
        @pl.when(kv == num_kv - 1)
        def _():
            l = l_scr[...]
            inv = pl.reciprocal(l, approx=approx_recip)
            # fully-masked rows (l == 0) -> zeros, matching torch attn[mask] = 0
            inv = jnp.where(l > 0.0, inv, 0.0)
            heads = (acc_scr[...] * inv).astype(compute_dtype)      # (tq, val_dim)
            out_scr[...] += jnp.dot(heads, wo_ref[h],
                                    preferred_element_type=jnp.float32)

        # ---- last head: emit the (b, q-tile) output block ----
        @pl.when((kv == num_kv - 1) & (h == num_heads - 1))
        def _():
            o_ref[...] = out_scr[...].astype(o_ref.dtype)

    return kernel


def _pick_block(n, preferred, quantum):
    """Largest tile <= preferred that divides n (multiple of quantum), else full n."""
    if n <= preferred:
        return n
    preferred = max(quantum, (preferred // quantum) * quantum)
    for cand in range(preferred, quantum - 1, -quantum):
        if n % cand == 0:
            return cand
    return n


def _default_vmem_budget():
    """Generation-aware VMEM budget (leave ~25% headroom; v7x has 64 MiB/core)."""
    cap = None
    try:
        info = pltpu.get_tpu_info()
        for name in ("vmem_capacity_bytes", "vmem_size_bytes", "vmem_bytes"):
            cap = getattr(info, name, None)
            if cap:
                break
    except Exception:
        cap = None
    if not cap:
        cap = 64 * 1024 * 1024          # conservative default = v7x per-core VMEM
    return min(int(cap) * 3 // 4, 100 * 1024 * 1024)


def multi_head_attention(q, k=None, v=None, mask=None, *,
                         W_query, W_key, W_val, W_out,
                         compute_dtype=jnp.bfloat16,
                         block_q=256, block_k=2048,
                         out_dtype=jnp.float32,
                         vmem_budget_bytes=None):
    """Pallas implementation of MultiHeadAttention.forward(q, k, v, mask)."""
    if k is None:
        k = q
    if v is None:
        v = k

    B, Lq, in_dim = q.shape
    _, Lk, _ = k.shape
    H, w_in, key_dim = W_query.shape
    val_dim = W_val.shape[-1]
    embed_dim = W_out.shape[-1]

    assert w_in == in_dim
    assert k.shape == (B, Lk, in_dim) and v.shape == (B, Lk, in_dim)
    assert W_key.shape == (H, in_dim, key_dim)
    assert W_val.shape == (H, in_dim, val_dim)
    assert W_out.shape == (H, key_dim, embed_dim)
    # torch flattens heads (n_heads*val_dim) against W_out.view(n_heads*key_dim, -1)
    assert val_dim == key_dim, "val_dim must equal key_dim (as in the torch module)"

    cdtype = jnp.dtype(compute_dtype)
    norm = 1.0 / math.sqrt(key_dim)

    # ---- hoisted Q/K/V projections (done once by XLA, streamed pre-projected) ----
    proj_prec = (lax.Precision.HIGHEST if cdtype == jnp.dtype(jnp.float32)
                 else lax.Precision.DEFAULT)

    def _project(x, w):
        y = jnp.einsum("bnd,hdk->bhnk", x.astype(cdtype), w.astype(cdtype),
                       precision=proj_prec, preferred_element_type=jnp.float32)
        return y.astype(cdtype)

    qp = _project(q, W_query)          # (B, H, Lq, key_dim)
    kp = _project(k, W_key)            # (B, H, Lk, key_dim)
    vp = _project(v, W_val)            # (B, H, Lk, val_dim)
    wo = W_out.astype(cdtype)          # (H, key_dim, embed_dim), resident in VMEM

    has_mask = mask is not None
    if has_mask:
        mask = jnp.asarray(mask)
        if mask.ndim == 2:                                   # (B, Lk) key-padding mask
            mask = jnp.broadcast_to(mask[:, None, :], (B, Lq, Lk))
        mask_i8 = (mask.reshape(B, Lq, Lk) != 0).astype(jnp.int8)

    # ---- tile selection (dtype-aware quanta, generation-aware VMEM budget) ----
    q_quantum = 8
    if cdtype == jnp.dtype(jnp.bfloat16):
        q_quantum = 16
    if has_mask:
        q_quantum = 32                                       # int8 min sublane packing
    tq = _pick_block(Lq, block_q, q_quantum)
    tk = _pick_block(Lk, block_k, 128)

    # v7x megacore: make sure both TensorCores get work when B == 1.
    if B * (Lq // tq) < 2 and Lq > q_quantum:
        cand = _pick_block(Lq, max(q_quantum, Lq // 2), q_quantum)
        if cand < Lq:
            tq = cand

    if vmem_budget_bytes is None:
        vmem_budget_bytes = _default_vmem_budget()

    c_isz = cdtype.itemsize
    o_isz = jnp.dtype(out_dtype).itemsize

    def _footprint(tq_, tk_):
        b = 0
        b += 2 * tq_ * key_dim * c_isz                 # Qp tile (double-buffered)
        b += 2 * tk_ * key_dim * c_isz                 # Kp tile
        b += 2 * tk_ * val_dim * c_isz                 # Vp tile
        if has_mask:
            b += 2 * tq_ * tk_                         # int8 mask tile
        b += 2 * H * key_dim * embed_dim * c_isz       # resident W_out
        b += 2 * tq_ * embed_dim * o_isz               # output tile
        b += tq_ * (2 + val_dim + embed_dim) * 4       # f32 scratch (m, l, acc, out)
        return b

    while _footprint(tq, tk) > vmem_budget_bytes:
        new_tk = _pick_block(Lk, max(128, tk // 2), 128)
        if new_tk < tk:
            tk = new_tk
            continue
        new_tq = _pick_block(Lq, max(q_quantum, tq // 2), q_quantum)
        if new_tq < tq:
            tq = new_tq
            continue
        break

    grid = (B, Lq // tq, H, Lk // tk)

    in_specs = [
        pl.BlockSpec((None, None, tq, key_dim), lambda b, qi, h, kv: (b, h, qi, 0)),  # Qp
        pl.BlockSpec((None, None, tk, key_dim), lambda b, qi, h, kv: (b, h, kv, 0)),  # Kp
        pl.BlockSpec((None, None, tk, val_dim), lambda b, qi, h, kv: (b, h, kv, 0)),  # Vp
    ]
    inputs = [qp, kp, vp]
    if has_mask:
        in_specs.append(pl.BlockSpec((None, tq, tk), lambda b, qi, h, kv: (b, qi, kv)))
        inputs.append(mask_i8)
    # Whole W_out resident with a constant index map -> DMA'd once per pallas_call.
    in_specs.append(pl.BlockSpec((H, key_dim, embed_dim), lambda b, qi, h, kv: (0, 0, 0)))
    inputs.append(wo)

    grid_spec = pltpu.PrefetchScalarGridSpec(
        num_scalar_prefetch=0,
        grid=grid,
        in_specs=in_specs,
        out_specs=pl.BlockSpec((None, tq, embed_dim), lambda b, qi, h, kv: (b, qi, 0)),
        scratch_shapes=[
            pltpu.VMEM((tq, 1), jnp.float32),          # running max
            pltpu.VMEM((tq, 1), jnp.float32),          # running sum
            pltpu.VMEM((tq, val_dim), jnp.float32),    # unnormalized head accumulator
            pltpu.VMEM((tq, embed_dim), jnp.float32),  # fused W_out output accumulator
        ],
    )

    # Advisory cost estimate so XLA schedules the hoisted einsums around the call.
    nq_tiles = Lq // tq
    flops = (2 * B * H * Lq * Lk * (key_dim + val_dim)
             + 2 * B * Lq * H * key_dim * embed_dim)
    transcendentals = B * H * Lq * Lk
    bytes_accessed = (B * H * Lq * key_dim * c_isz
                      + nq_tiles * B * H * Lk * (key_dim + val_dim) * c_isz
                      + B * Lq * embed_dim * o_isz
                      + H * key_dim * embed_dim * c_isz)
    if has_mask:
        bytes_accessed += B * H * Lq * Lk              # int8 mask, re-read per head
    cost = pl.CostEstimate(flops=int(flops),
                           transcendentals=int(transcendentals),
                           bytes_accessed=int(bytes_accessed))

    return pl.pallas_call(
        _make_mha_kernel(has_mask, cdtype, norm),
        out_shape=jax.ShapeDtypeStruct((B, Lq, embed_dim), out_dtype),
        grid_spec=grid_spec,
        compiler_params=pltpu.CompilerParams(
            # B and the Lq-tile axis are independent -> shard across TensorCores
            # (v7x megacore); head and Lk axes carry scratch accumulators.
            dimension_semantics=("parallel", "parallel", "arbitrary", "arbitrary"),
            vmem_limit_bytes=int(vmem_budget_bytes),
        ),
        cost_estimate=cost,
    )(*inputs)


def multi_head_attention_ref(q, k, v, W_query, W_key, W_val, W_out, mask=None):
    """Pure-JAX reference mirroring the PyTorch forward exactly (f32, HIGHEST)."""
    H, in_dim, key_dim = W_query.shape
    val_dim = W_val.shape[-1]
    embed_dim = W_out.shape[-1]
    B, Lq, _ = q.shape
    norm = 1.0 / math.sqrt(key_dim)
    hp = lax.Precision.HIGHEST

    Q = jnp.einsum("bnd,hde->hbne", q, W_query, precision=hp)
    K = jnp.einsum("bmd,hde->hbme", k, W_key, precision=hp)
    V = jnp.einsum("bmd,hde->hbme", v, W_val, precision=hp)

    compat = norm * jnp.einsum("hbne,hbme->hbnm", Q, K, precision=hp)
    if mask is not None:
        m = jnp.broadcast_to(mask.astype(bool)[None], compat.shape)
        compat = jnp.where(m, -jnp.inf, compat)
    e = jnp.exp(compat - jnp.max(compat, axis=-1, keepdims=True))
    attn = e / jnp.sum(e, axis=-1, keepdims=True)
    if mask is not None:
        attn = jnp.where(m, 0.0, attn)        # torch: attnc[mask] = 0 (handles NaN rows)
    heads = jnp.einsum("hbnm,hbme->hbne", attn, V, precision=hp)   # (H, B, Lq, val_dim)
    heads_cat = jnp.transpose(heads, (1, 2, 0, 3)).reshape(B, Lq, H * val_dim)
    return jnp.dot(heads_cat, W_out.reshape(H * key_dim, embed_dim), precision=hp)


if __name__ == "__main__":
    B, Lq, Lk = 2, 8, 8
    n_heads, input_dim, embed_dim = 4, 32, 32
    key_dim = val_dim = embed_dim // n_heads          # 8, as in the torch defaults

    root = jax.random.PRNGKey(0)
    kq, kk, kv_, kwq, kwk, kwv, kwo, kmask, kmask2 = jax.random.split(root, 9)

    q = jax.random.normal(kq, (B, Lq, input_dim), dtype=jnp.float32)
    k = jax.random.normal(kk, (B, Lk, input_dim), dtype=jnp.float32)
    v = jax.random.normal(kv_, (B, Lk, input_dim), dtype=jnp.float32)

    def init_param(rng, shape):
        stdv = 1.0 / math.sqrt(shape[-1])   # nn.Parameter(...).uniform_(-stdv, stdv)
        return jax.random.uniform(rng, shape, minval=-stdv, maxval=stdv,
                                  dtype=jnp.float32)

    W_query = init_param(kwq, (n_heads, input_dim, key_dim))
    W_key = init_param(kwk, (n_heads, input_dim, key_dim))
    W_val = init_param(kwv, (n_heads, input_dim, val_dim))
    W_out = init_param(kwo, (n_heads, key_dim, embed_dim))

    # Random mask (nonzero => masked), plus one fully-masked query row to
    # exercise the torch "-inf softmax row -> zeros" path.
    mask = jax.random.uniform(kmask, (B, Lq, Lk)) < 0.25
    mask = mask.at[0, 0, :].set(True)
    mask = mask.astype(jnp.int32)

    ref_masked = multi_head_attention_ref(q, k, v, W_query, W_key, W_val, W_out, mask)
    ref_nomask = multi_head_attention_ref(q, k, v, W_query, W_key, W_val, W_out, None)

    params = dict(W_query=W_query, W_key=W_key, W_val=W_val, W_out=W_out)

    # 1) f32 path with mask: tight check against the reference.
    out_f32 = jax.block_until_ready(
        multi_head_attention(q, k, v, mask, compute_dtype=jnp.float32, **params))
    assert out_f32.shape == (B, Lq, embed_dim)
    assert jnp.allclose(out_f32, ref_masked, atol=1e-4, rtol=1e-4), "f32 masked mismatch"

    # 2) f32 path, mask=None: specialized kernel with no mask input/DMA at all.
    out_nomask = jax.block_until_ready(
        multi_head_attention(q, k, v, None, compute_dtype=jnp.float32, **params))
    assert jnp.allclose(out_nomask, ref_nomask, atol=1e-4, rtol=1e-4), "no-mask mismatch"

    # 3) bf16 fast path (MXU-rate inputs, f32 accumulation): looser tolerance.
    out_bf16 = jax.block_until_ready(
        multi_head_attention(q, k, v, mask, compute_dtype=jnp.bfloat16, **params))
    assert out_bf16.dtype == jnp.float32
    assert jnp.allclose(out_bf16, ref_masked, atol=1e-1, rtol=1e-1), "bf16 masked mismatch"

    # 4) 2-D (B, Lk) key-padding mask with Lq > 1 (fixed broadcast path).
    mask2d = (jax.random.uniform(kmask2, (B, Lk)) < 0.25).astype(jnp.int32)
    ref_2d = multi_head_attention_ref(
        q, k, v, W_query, W_key, W_val, W_out,
        jnp.broadcast_to(mask2d[:, None, :], (B, Lq, Lk)))
    out_2d = jax.block_until_ready(
        multi_head_attention(q, k, v, mask2d, compute_dtype=jnp.float32, **params))
    assert jnp.allclose(out_2d, ref_2d, atol=1e-4, rtol=1e-4), "2-D mask mismatch"

    print("KERNEL_OK")
</pallas_src>

<mosaic_0001>
module attributes {stable_mosaic.version = 11 : i64} {
  func.func @kernel(%arg0: i32, %arg1: i32, %arg2: i32, %arg3: i32, %arg4: memref<1x1x8x8xf32, #tpu.memory_space<vmem>>, %arg5: memref<1x1x8x8xf32, #tpu.memory_space<vmem>>, %arg6: memref<1x1x8x8xf32, #tpu.memory_space<vmem>>, %arg7: memref<1x8x8xi8, #tpu.memory_space<vmem>>, %arg8: memref<4x8x32xf32, #tpu.memory_space<vmem>>, %arg9: memref<1x8x32xf32, #tpu.memory_space<vmem>>, %arg10: memref<8x1xf32, #tpu.memory_space<vmem>>, %arg11: memref<8x1xf32, #tpu.memory_space<vmem>>, %arg12: memref<8x8xf32, #tpu.memory_space<vmem>>, %arg13: memref<8x32xf32, #tpu.memory_space<vmem>>) attributes {dimension_semantics = [#tpu.dimension_semantics<parallel>, #tpu.dimension_semantics<parallel>, #tpu.dimension_semantics<arbitrary>, #tpu.dimension_semantics<arbitrary>], iteration_bounds = array<i64: 2, 1, 4, 1>, scalar_prefetch = 0 : i64, scratch_operands = 4 : i64, tpu.core_type = #tpu.core_type<tc>, window_params = [{transform_indices = @transform_0, window_bounds = array<i64: 1, 1, 8, 8>}, {transform_indices = @transform_1, window_bounds = array<i64: 1, 1, 8, 8>}, {transform_indices = @transform_2, window_bounds = array<i64: 1, 1, 8, 8>}, {transform_indices = @transform_3, window_bounds = array<i64: 1, 8, 8>}, {pipeline_mode = #tpu.pipeline_mode<synchronous>, transform_indices = @transform_4, window_bounds = array<i64: 4, 8, 32>}, {transform_indices = @transform_5, window_bounds = array<i64: 1, 8, 32>}]} {
    %c0_i32 = arith.constant 0 : i32
    %0 = arith.cmpi eq, %arg3, %c0_i32 : i32
    %1 = arith.extui %0 : i1 to i32
    %c0_i32_0 = arith.constant 0 : i32
    %2 = arith.cmpi ne, %1, %c0_i32_0 : i32
    scf.if %2 {
      %cst_40 = arith.constant -1.000000e+30 : f32
      %55 = vector.broadcast %cst_40 : f32 to vector<8x1xf32>
      %c0_41 = arith.constant 0 : index
      %c0_42 = arith.constant 0 : index
      %56 = vector.load %arg10[%c0_41, %c0_42] : memref<8x1xf32, #tpu.memory_space<vmem>>, vector<8x1xf32>
      tpu.vector_store %arg10[%c0_41, %c0_42], %55 {strides = array<i32>} : memref<8x1xf32, #tpu.memory_space<vmem>>, vector<8x1xf32>,
      %cst_43 = arith.constant 0.000000e+00 : f32
      %57 = vector.broadcast %cst_43 : f32 to vector<8x1xf32>
      %c0_44 = arith.constant 0 : index
      %c0_45 = arith.constant 0 : index
      %58 = vector.load %arg11[%c0_44, %c0_45] : memref<8x1xf32, #tpu.memory_space<vmem>>, vector<8x1xf32>
      tpu.vector_store %arg11[%c0_44, %c0_45], %57 {strides = array<i32>} : memref<8x1xf32, #tpu.memory_space<vmem>>, vector<8x1xf32>,
      %cst_46 = arith.constant 0.000000e+00 : f32
      %59 = vector.broadcast %cst_46 : f32 to vector<8x8xf32>
      %c0_47 = arith.constant 0 : index
      %c0_48 = arith.constant 0 : index
      %60 = vector.load %arg12[%c0_47, %c0_48] : memref<8x8xf32, #tpu.memory_space<vmem>>, vector<8x8xf32>
      tpu.vector_store %arg12[%c0_47, %c0_48], %59 {strides = array<i32>} : memref<8x8xf32, #tpu.memory_space<vmem>>, vector<8x8xf32>,
    } else {
    }
    %c0_i32_1 = arith.constant 0 : i32
    %3 = arith.cmpi eq, %arg3, %c0_i32_1 : i32
    %c0_i32_2 = arith.constant 0 : i32
    %4 = arith.cmpi eq, %arg2, %c0_i32_2 : i32
    %5 = arith.andi %3, %4 : i1
    %6 = arith.extui %5 : i1 to i32
    %c0_i32_3 = arith.constant 0 : i32
    %7 = arith.cmpi ne, %6, %c0_i32_3 : i32
    scf.if %7 {
      %cst_40 = arith.constant 0.000000e+00 : f32
      %55 = vector.broadcast %cst_40 : f32 to vector<8x32xf32>
      %c0_41 = arith.constant 0 : index
      %c0_42 = arith.constant 0 : index
      %56 = vector.load %arg13[%c0_41, %c0_42] : memref<8x32xf32, #tpu.memory_space<vmem>>, vector<8x32xf32>
      tpu.vector_store %arg13[%c0_41, %c0_42], %55 {strides = array<i32>} : memref<8x32xf32, #tpu.memory_space<vmem>>, vector<8x32xf32>,
    } else {
    }
    %c0 = arith.constant 0 : index
    %c0_4 = arith.constant 0 : index
    %c0_5 = arith.constant 0 : index
    %c0_6 = arith.constant 0 : index
    %8 = vector.load %arg4[%c0, %c0_4, %c0_5, %c0_6] : memref<1x1x8x8xf32, #tpu.memory_space<vmem>>, vector<1x1x8x8xf32>
    %9 = vector.shape_cast %8 : vector<1x1x8x8xf32> to vector<8x8xf32>
    %c0_7 = arith.constant 0 : index
    %c0_8 = arith.constant 0 : index
    %c0_9 = arith.constant 0 : index
    %c0_10 = arith.constant 0 : index
    %10 = vector.load %arg5[%c0_7, %c0_8, %c0_9, %c0_10] : memref<1x1x8x8xf32, #tpu.memory_space<vmem>>, vector<1x1x8x8xf32>
    %11 = vector.shape_cast %10 : vector<1x1x8x8xf32> to vector<8x8xf32>
    %cst = arith.constant dense<0.000000e+00> : vector<8x8xf32>
    %12 = tpu.matmul %9, %11, %cst {dimension_numbers = #tpu.dot_dimension_numbers<[1], [1], [0], [0], [0, 0, 1, 0], [], []>} : vector<8x8xf32>, vector<8x8xf32>, vector<8x8xf32> -> vector<8x8xf32>
    %cst_11 = arith.constant 0.353553385 : f32
    %13 = vector.broadcast %cst_11 : f32 to vector<8x8xf32>
    %14 = arith.mulf %12, %13 : vector<8x8xf32>
    %c0_12 = arith.constant 0 : index
    %c0_13 = arith.constant 0 : index
    %c0_14 = arith.constant 0 : index
    %15 = vector.load %arg7[%c0_12, %c0_13, %c0_14] : memref<1x8x8xi8, #tpu.memory_space<vmem>>, vector<1x8x8xi8>
    %16 = vector.shape_cast %15 : vector<1x8x8xi8> to vector<8x8xi8>
    %c0_i8 = arith.constant 0 : i8
    %17 = vector.broadcast %c0_i8 : i8 to vector<8x8xi8>
    %18 = arith.cmpi ne, %16, %17 : vector<8x8xi8>
    %cst_15 = arith.constant -1.000000e+30 : f32
    %19 = vector.broadcast %cst_15 : f32 to vector<8x8xf32>
    %20 = arith.select %18, %19, %14 : vector<8x8xi1>, vector<8x8xf32>
    %c0_16 = arith.constant 0 : index
    %c0_17 = arith.constant 0 : index
    %21 = vector.load %arg10[%c0_16, %c0_17] : memref<8x1xf32, #tpu.memory_space<vmem>>, vector<8x1xf32>
    %cst_18 = arith.constant dense<0xFF800000> : vector<8xf32>
    %22 = vector.multi_reduction <maximumf>, %20, %cst_18 [1] : vector<8x8xf32> to vector<8xf32>
    %23 = vector.shape_cast %22 : vector<8xf32> to vector<8x1xf32>
    %24 = arith.maximumf %21, %23 : vector<8x1xf32>
    %25 = arith.subf %21, %24 : vector<8x1xf32>
    %26 = math.exp %25 : vector<8x1xf32>
    %27 = vector.broadcast %24 : vector<8x1xf32> to vector<8x8xf32>
    %28 = arith.subf %20, %27 : vector<8x8xf32>
    %29 = math.exp %28 : vector<8x8xf32>
    %cst_19 = arith.constant 0.000000e+00 : f32
    %30 = vector.broadcast %cst_19 : f32 to vector<8x8xf32>
    %31 = arith.select %18, %30, %29 : vector<8x8xi1>, vector<8x8xf32>
    %c0_20 = arith.constant 0 : index
    %c0_21 = arith.constant 0 : index
    %32 = vector.load %arg11[%c0_20, %c0_21] : memref<8x1xf32, #tpu.memory_space<vmem>>, vector<8x1xf32>
    %33 = arith.mulf %26, %32 : vector<8x1xf32>
    %cst_22 = arith.constant dense<0.000000e+00> : vector<8xf32>
    %34 = vector.multi_reduction <add>, %31, %cst_22 [1] : vector<8x8xf32> to vector<8xf32>
    %35 = vector.shape_cast %34 : vector<8xf32> to vector<8x1xf32>
    %36 = arith.addf %33, %35 : vector<8x1xf32>
    %c0_23 = arith.constant 0 : index
    %c0_24 = arith.constant 0 : index
    %37 = vector.load %arg11[%c0_23, %c0_24] : memref<8x1xf32, #tpu.memory_space<vmem>>, vector<8x1xf32>
    tpu.vector_store %arg11[%c0_23, %c0_24], %36 {strides = array<i32>} : memref<8x1xf32, #tpu.memory_space<vmem>>, vector<8x1xf32>,
    %c0_25 = arith.constant 0 : index
    %c0_26 = arith.constant 0 : index
    %38 = vector.load %arg12[%c0_25, %c0_26] : memref<8x8xf32, #tpu.memory_space<vmem>>, vector<8x8xf32>
    %39 = vector.broadcast %26 : vector<8x1xf32> to vector<8x8xf32>
    %40 = arith.mulf %39, %38 : vector<8x8xf32>
    %c0_27 = arith.constant 0 : index
    %c0_28 = arith.constant 0 : index
    %c0_29 = arith.constant 0 : index
    %c0_30 = arith.constant 0 : index
    %41 = vector.load %arg6[%c0_27, %c0_28, %c0_29, %c0_30] : memref<1x1x8x8xf32, #tpu.memory_space<vmem>>, vector<1x1x8x8xf32>
    %42 = vector.shape_cast %41 : vector<1x1x8x8xf32> to vector<8x8xf32>
    %cst_31 = arith.constant dense<0.000000e+00> : vector<8x8xf32>
    %43 = tpu.matmul %31, %42, %cst_31 {dimension_numbers = #tpu.dot_dimension_numbers<[1], [0], [0], [1], [0, 0, 1, 1], [], []>} : vector<8x8xf32>, vector<8x8xf32>, vector<8x8xf32> -> vector<8x8xf32>
    %44 = arith.addf %40, %43 : vector<8x8xf32>
    %c0_32 = arith.constant 0 : index
    %c0_33 = arith.constant 0 : index
    %45 = vector.load %arg12[%c0_32, %c0_33] : memref<8x8xf32, #tpu.memory_space<vmem>>, vector<8x8xf32>
    tpu.vector_store %arg12[%c0_32, %c0_33], %44 {strides = array<i32>} : memref<8x8xf32, #tpu.memory_space<vmem>>, vector<8x8xf32>,
    %c0_34 = arith.constant 0 : index
    %c0_35 = arith.constant 0 : index
    %46 = vector.load %arg10[%c0_34, %c0_35] : memref<8x1xf32, #tpu.memory_space<vmem>>, vector<8x1xf32>
    tpu.vector_store %arg10[%c0_34, %c0_35], %24 {strides = array<i32>} : memref<8x1xf32, #tpu.memory_space<vmem>>, vector<8x1xf32>,
    %c0_i32_36 = arith.constant 0 : i32
    %47 = arith.cmpi eq, %arg3, %c0_i32_36 : i32
    %48 = arith.extui %47 : i1 to i32
    %c0_i32_37 = arith.constant 0 : i32
    %49 = arith.cmpi ne, %48, %c0_i32_37 : i32
    scf.if %49 {
      %c0_40 = arith.constant 0 : index
      %c0_41 = arith.constant 0 : index
      %55 = vector.load %arg11[%c0_40, %c0_41] : memref<8x1xf32, #tpu.memory_space<vmem>>, vector<8x1xf32>
      %56 = tpu.reciprocal %55 : vector<8x1xf32> -> vector<8x1xf32>
      %cst_42 = arith.constant 0.000000e+00 : f32
      %57 = vector.broadcast %cst_42 : f32 to vector<8x1xf32>
      %58 = arith.cmpf ogt, %55, %57 : vector<8x1xf32>
      %cst_43 = arith.constant 0.000000e+00 : f32
      %59 = vector.broadcast %cst_43 : f32 to vector<8x1xf32>
      %60 = arith.select %58, %56, %59 : vector<8x1xi1>, vector<8x1xf32>
      %c0_44 = arith.constant 0 : index
      %c0_45 = arith.constant 0 : index
      %61 = vector.load %arg12[%c0_44, %c0_45] : memref<8x8xf32, #tpu.memory_space<vmem>>, vector<8x8xf32>
      %62 = vector.broadcast %60 : vector<8x1xf32> to vector<8x8xf32>
      %63 = arith.mulf %61, %62 : vector<8x8xf32>
      %c0_46 = arith.constant 0 : index
      %c0_47 = arith.constant 0 : index
      %64 = vector.load %arg13[%c0_46, %c0_47] : memref<8x32xf32, #tpu.memory_space<vmem>>, vector<8x32xf32>
      %65 = arith.index_cast %arg2 : i32 to index
      %c0_48 = arith.constant 0 : index
      %c0_49 = arith.constant 0 : index
      %66 = vector.load %arg8[%65, %c0_48, %c0_49] : memref<4x8x32xf32, #tpu.memory_space<vmem>>, vector<1x8x32xf32>
      %67 = vector.shape_cast %66 : vector<1x8x32xf32> to vector<8x32xf32>
      %cst_50 = arith.constant dense<0.000000e+00> : vector<8x32xf32>
      %68 = tpu.matmul %63, %67, %cst_50 {dimension_numbers = #tpu.dot_dimension_numbers<[1], [0], [0], [1], [0, 0, 1, 1], [], []>} : vector<8x8xf32>, vector<8x32xf32>, vector<8x32xf32> -> vector<8x32xf32>
      %69 = arith.addf %64, %68 : vector<8x32xf32>
      %c0_51 = arith.constant 0 : index
      %c0_52 = arith.constant 0 : index
      %70 = vector.load %arg13[%c0_51, %c0_52] : memref<8x32xf32, #tpu.memory_space<vmem>>, vector<8x32xf32>
      tpu.vector_store %arg13[%c0_51, %c0_52], %69 {strides = array<i32>} : memref<8x32xf32, #tpu.memory_space<vmem>>, vector<8x32xf32>,
    } else {
    }
    %c0_i32_38 = arith.constant 0 : i32
    %50 = arith.cmpi eq, %arg3, %c0_i32_38 : i32
    %c3_i32 = arith.constant 3 : i32
    %51 = arith.cmpi eq, %arg2, %c3_i32 : i32
    %52 = arith.andi %50, %51 : i1
    %53 = arith.extui %52 : i1 to i32
    %c0_i32_39 = arith.constant 0 : i32
    %54 = arith.cmpi ne, %53, %c0_i32_39 : i32
    scf.if %54 {
      %c0_40 = arith.constant 0 : index
      %c0_41 = arith.constant 0 : index
      %55 = vector.load %arg13[%c0_40, %c0_41] : memref<8x32xf32, #tpu.memory_space<vmem>>, vector<8x32xf32>
      %c0_42 = arith.constant 0 : index
      %c0_43 = arith.constant 0 : index
      %c0_44 = arith.constant 0 : index
      %56 = vector.load %arg9[%c0_42, %c0_43, %c0_44] : memref<1x8x32xf32, #tpu.memory_space<vmem>>, vector<1x8x32xf32>
      %57 = vector.shape_cast %56 : vector<1x8x32xf32> to vector<8x32xf32>
      %58 = vector.shape_cast %55 : vector<8x32xf32> to vector<1x8x32xf32>
      tpu.vector_store %arg9[%c0_42, %c0_43, %c0_44], %58 {strides = array<i32>} : memref<1x8x32xf32, #tpu.memory_space<vmem>>, vector<1x8x32xf32>,
    } else {
    }
    return
  }
  func.func @transform_0(%arg0: i32, %arg1: i32, %arg2: i32, %arg3: i32) -> (i32, i32, i32, i32) {
    %c0_i32 = arith.constant 0 : i32
    %c0_i32_0 = arith.constant 0 : i32
    return %arg0, %arg2, %arg1, %c0_i32 : i32, i32, i32, i32
  }
  func.func @transform_1(%arg0: i32, %arg1: i32, %arg2: i32, %arg3: i32) -> (i32, i32, i32, i32) {
    %c0_i32 = arith.constant 0 : i32
    %c0_i32_0 = arith.constant 0 : i32
    return %arg0, %arg2, %arg3, %c0_i32 : i32, i32, i32, i32
  }
  func.func @transform_2(%arg0: i32, %arg1: i32, %arg2: i32, %arg3: i32) -> (i32, i32, i32, i32) {
    %c0_i32 = arith.constant 0 : i32
    %c0_i32_0 = arith.constant 0 : i32
    return %arg0, %arg2, %arg3, %c0_i32 : i32, i32, i32, i32
  }
  func.func @transform_3(%arg0: i32, %arg1: i32, %arg2: i32, %arg3: i32) -> (i32, i32, i32) {
    %c0_i32 = arith.constant 0 : i32
    return %arg0, %arg1, %arg3 : i32, i32, i32
  }
  func.func @transform_4(%arg0: i32, %arg1: i32, %arg2: i32, %arg3: i32) -> (i32, i32, i32) {
    %c0_i32 = arith.constant 0 : i32
    %c0_i32_0 = arith.constant 0 : i32
    %c0_i32_1 = arith.constant 0 : i32
    %c0_i32_2 = arith.constant 0 : i32
    return %c0_i32, %c0_i32_0, %c0_i32_1 : i32, i32, i32
  }
  func.func @transform_5(%arg0: i32, %arg1: i32, %arg2: i32, %arg3: i32) -> (i32, i32, i32) {
    %c0_i32 = arith.constant 0 : i32
    %c0_i32_0 = arith.constant 0 : i32
    return %arg0, %arg1, %c0_i32 : i32, i32, i32
  }
}

</mosaic_0001>

<bundles_post_ra>
// kernel: tpu_custom_call.1
= control target key start
LH: loop header
LB: loop body
LE: loop exit
PB: predicated region body
PF: predicated region fallthrough
CT: control target
= control target key end

     0   :  { %s1786_s0 = inlined_call_operand.hbm [shape: f32[2,4,8,8], index: 0, kind: input, shape index: {}]   ;;  %s1787_s1 = inlined_call_operand.hbm [shape: f32[2,4,8,8], index: 1, kind: input, shape index: {}]   ;;  %s1788_s2 = inlined_call_operand.hbm [shape: f32[2,4,8,8], index: 2, kind: input, shape index: {}]   ;;  %s1789_s3 = inlined_call_operand.vmem [shape: s8[2,8,8], index: 3, kind: input, shape index: {}]   ;;  %s1790_s4 = inlined_call_operand.hbm [shape: f32[4,8,32], index: 4, kind: input, shape index: {}]   ;;  %s1791_s5 = inlined_call_operand.hbm [shape: f32[2,8,32], index: 5, kind: output, shape index: {}]  }
   0x1   :  { %1814 = sst [smem:[#allocation31_spill]] %s1787_s1 }
   0x2   :  { %1815 = sst [smem:[#allocation32_spill]] %s1789_s3 }
   0x3   :  { %1816 = sst [smem:[#allocation33_spill]] %s1791_s5 }
   0x4   :  { %10 = vsyncpa [#allocation7], 0 }
   0x5   :  { %12 = vsyncpa [#allocation7 + $0x1], 0 }
   0x6   :  { %13 = vsyncpa [#allocation10], 0 }
   0x7   :  { %15 = vsyncpa [#allocation10 + $0x1], 0 }
   0x8   :  { %16 = vsyncpa [#allocation13], 0 }
   0x9   :  { %17 = vsyncpa [#allocation8], 0 }
   0xa   :  { %19 = vsyncpa [#allocation8 + $0x1], 0  ;;  %s1399_s18 = smov 0   ;;  %s1401_s19 = smov 0  }
   0xb   :  { %s1403_s20 = smov 0   ;;  %s1405_s21 = smov 0  }
   0xc   :  { %s1407_s22 = smov 0   ;;  %s1409_s23 = smov 0  }
   0xd   :  { %s1411_s24 = smov 0   ;;  %s1413_s25 = smov 0  }
   0xe   :  { %s1415_s26 = smov 0   ;;  %s1417_s27 = smov 0  }
   0xf   :  { %s1419_s28 = smov 0  }
  0x10 LB: > { %1817 = sst [smem:[#allocation19_spill]] %s1315_s18  ;;  %s43_s29 = sadd.s32 1, %s1347_s26  ;;  %s1355_s28 = sphi %s1419_s28, %s25_s28   ;;  %s1351_s27 = sphi %s1417_s27, %s1865_s27   ;;  %s1347_s26 = sphi %s1415_s26, %s1864_s26   ;;  %s1343_s25 = sphi %s1413_s25, %s1863_s25   ;;  %s1339_s24 = sphi %s1411_s24, %s1862_s24   ;;  %s1335_s23 = sphi %s1409_s23, %s1870_s23   ;;  %s1331_s22 = sphi %s1407_s22, %s1869_s22   ;;  %s1327_s21 = sphi %s1405_s21, %s1868_s21   ;;  %s1323_s20 = sphi %s1403_s20, %s1860_s20   ;;  %s1319_s19 = sphi %s1401_s19, %s1867_s19   ;;  %s1315_s18 = sphi %s1399_s18, %s1866_s18  }
  0x11   : > { %1818 = sst [smem:[#allocation20_spill]] %s1323_s20  ;;  %s51_s30 = sadd.s32 1, %s1351_s27 }
  0x12   : > { %1819 = sst [smem:[#allocation21_spill]] %s1339_s24  ;;  %p45_p0 = scmp.ge.s32.totalorder %s43_s29, 4 }
  0x13   : > { %1820 = sst [smem:[#allocation22_spill]] %s1347_s26  ;;  %s62_s6 = sadd.s32 1, %s1335_s23 }
  0x14   : > { %1821 = sst [smem:[#allocation23_spill]] %s1351_s27  ;;  %p69_p1 = scmp.ne.s32.totalorder %s1335_s23, %s1331_s22 }
  0x15   : > { %1822 = sst [smem:[#allocation24_spill]] %s1355_s28  ;;  %p70_p2 = scmp.eq.s32.totalorder %s1355_s28, 0 }
  0x16   : > { %s1872_s29 = smov (%p45_p0, %s43_s29), 0  ;;  %s1874_s30 = smov (!%p45_p0, %s51_s30), %s1351_s27 }
  0x17   : > { %1823 = sst [smem:[#allocation25_spill]] %s1872_s29  ;;  %s56_s7 = ssub.s32 %s1347_s26, %s1872_s29 }
  0x18   : > { %p1465_p3 = por %p70_p2, %p69_p1  ;;  %p53_p4 = scmp.ge.s32.totalorder %s1874_s30, 2 }
  0x19   : > { %s201_s9 = sadd.s32 1, %s1323_s20  ;;  %p1000_p5 = scmp.lt.s32.totalorder %s1355_s28, 8 }
  0x1a   : > { %s1876_s30 = smov (%p53_p4, %s1874_s30), 0  ;;  %s1794_s10 = sand.u32 1, %s1335_s23  }
  0x1b   : > { %1825 = sst [smem:[#allocation26_spill]] %s1876_s30  ;;  %s920_s11 = sshll.u32 %s1351_s27, 2 }
  0x1c   : > { %s55_s12 = ssub.s32 %s1351_s27, %s1876_s30  ;;  %s1479_s13 = sshll.u32 %s1794_s10, 3 }
  0x1d   : > { %s57_s14 = sor.u32 %s56_s7, %s55_s12  ;;  %p199_p6 = scmp.eq.s32.totalorder %s55_s12, 0 }
  0x1e   : > { %p60_p7 = scmp.eq.s32.totalorder %s57_s14, 0  ;;  %s261_s15 = sadd.s32 %s1347_s26, %s920_s11 }
  0x1f   : > { %s1483_s16 = scalar_select %p199_p6, %s1323_s20, %s201_s9  }
  0x20   : > { %s1486_s17 = scalar_select %p60_p7, %s1335_s23, %s62_s6  }
  0x21   : > { %1826 = sst [smem:[#allocation27_spill]] %s1483_s16  ;;  %s1488_s29 = sshll.u32 %s261_s15, 7 }
  0x22   : > { %1827 = sst [smem:[#allocation28_spill]] %s1486_s17  ;;  %p1494_p8 = pnand %p1000_p5, %p1465_p3 }
  0x23   : > { %s272_s10 = sand.u32 1, %s1355_s28   ;;  %s1829_s1 = sld [smem:[#allocation31_spill]] }
  0x24   : > { %s1828_s5 = scalar_select %p1494_p8, 1, 0 }
  0x25   : > { %s276_s6 = scalar_lea.vmem [#allocation9], %s1479_s13  ;;  %s1508_s8 = scalar_lea.sflag [#allocation10], %s272_s10 }
  0x26   : > { %s286_s9 = sshll.u32 %s276_s6, 4  ;;  %p1514_p10 = pneg %p1494_p8  ;;  %s1506_s9 = int_to_ptr.vmem [resolvable:$true] %s286_s9 }
  0x28   : > { %s1830_s14 = scalar_select %p1514_p10, 1, 0 }
  0x29   : > { %s1503_s12 = scalar_lea.hbm %s1829_s1, %s1488_s29  ;;  %s1112_s7 = scalar_lea.hbm %s1829_s1, 1024 }
  0x2a   : > { %s1107_s11 = scalar_lea.hbm %s1503_s12, 128  ;;  %p1113_p13 = scmp.lt.u32.totalorder %s1503_s12, %s1829_s1 }
  0x2b   : > { %p1108_p9 = scmp.ne.s32.totalorder %s1503_s12, %s1107_s11  ;;  %p1114_p0 = scmp.lt.u32.totalorder %s1112_s7, %s1107_s11 }
  0x2c   : > { %p1116_p2 = scmp.lt.u32.totalorder %s1107_s11, %s1503_s12 }
  0x2d   : > { %p1110_p11 = pnand %p1514_p10, %p1108_p9  ;;  %p1115_p1 = por %p1114_p0, %p1113_p13 }
  0x2f   : > { %p1111_p12 = pneg %p1110_p11  ;;  %p1117_p3 = por %p1116_p2, %p1115_p1 }
  0x31   : > { %p1118_p4 = pnand %p1117_p3, %p1111_p12 }
  0x33   : > { %1121 = shalt.err (!%p1118_p4)
}
  0x34   : > { %s1122_s10 = scalar_lea.vmem %s1506_s9, 128  ;;  %s1357_s30 = smov [#allocation9]  }
  0x35   : > { %p1123_p5 = scmp.ne.s32.totalorder %s1506_s9, %s1122_s10  ;;  %s1127_s15 = sshll.u32 %s1357_s30, 4  ;;  %s1128_s15 = int_to_ptr.vmem [resolvable:$false] %s1127_s15 }
  0x36   : > { %s1129_s27 = scalar_lea.vmem %s1128_s15, 256  ;;  %p1130_p9 = scmp.lt.s32.totalorder %s1506_s9, %s1128_s15 }
  0x37   : > { %p1125_p6 = pnand %p1123_p5, %p1514_p10  ;;  %p1131_p11 = scmp.lt.s32.totalorder %s1129_s27, %s1122_s10 }
  0x39   : > { %p1126_p7 = pneg %p1125_p6  ;;  %p1132_p13 = por %p1131_p11, %p1130_p9 }
  0x3b   : > { %p1133_p0 = pnand %p1132_p13, %p1126_p7 }
  0x3d   : > { %1136 = shalt.err (!%p1133_p0)
}
  0x3e   : > { %991 = dma.hbm_to_vmem [thread:$0]  (!%p1494_p8), %s1503_s12, 128, %s1506_s9, %s1508_s8  }
  0x3f   : > { %s1539_s11 = sadd.s32 4294967295, %s1355_s28   ;;  %s915_s7 = sadd.s32 4294967294, %s1355_s28  }
  0x40   : > { %p75_p12 = scmp.ne.s32.totalorder %s1331_s22, %s1327_s21  ;;  %p1801_p1 = scmp.eq.s32.totalorder %s1539_s11, 0 }
  0x41   : > { %p211_p2 = scmp.ne.s32.totalorder %s1323_s20, %s1319_s19  ;;  %p212_p3 = scmp.eq.s32.totalorder %s1539_s11, 7 }
  0x42   : > { %p217_p4 = scmp.ne.s32.totalorder %s1319_s19, %s1315_s18  ;;  %p1552_p5 = por %p1801_p1, %p75_p12 }
  0x43   : > { %p218_p6 = scmp.eq.s32.totalorder %s915_s7, 7  ;;  %p1556_p7 = por %p212_p3, %p211_p2 }
  0x44   : > { %s1831_s6 = scalar_select %p1552_p5, 1, 0 }
  0x45   : > { %s1832_s12 = scalar_select %p1556_p7, 1, 0 }
  0x46   : > { %p916_p9 = scmp.ge.s32.totalorder %s1355_s28, 1  ;;  %p1561_p11 = por %p218_p6, %p217_p4 }
  0x47   : > { %1833 = sst [smem:[#allocation29_spill]] %s1832_s12  ;;  %p225_p13 = scmp.lt.s32.totalorder %s1355_s28, 9 }
  0x48   : > { %s1834_s21 = scalar_select %p1561_p11, 1, 0 }
  0x49   : > { %p1566_p0 = pnand %p916_p9, %p225_p13  ;;  %s1358_s10 = smov [#allocation12]  }
  0x4a   : > { %1835 = sst [smem:[#allocation30_spill]] %s1834_s21  ;;  %s237_s30 = sshll.u32 %s1358_s10, 4  ;;  %s1570_s30 = int_to_ptr.vmem [resolvable:$true] %s237_s30 }
  0x4b   : > { %s1836_s9 = scalar_select %p1566_p0, 1, 0 }
  0x4c   : > { %p981_p12 = pneg %p1566_p0  ;;  %s1584_s1 = scalar_lea.hbm %s1786_s0, %s1488_s29 }
  0x4d   : > { %s255_s26 = scalar_lea.vmem [#allocation6], %s1479_s13  ;;  %s1137_s20 = scalar_lea.hbm %s1790_s4, 512 }
  0x4e   : > { %p1576_p2 = pnand %p981_p12, %p1801_p1  ;;  %s265_s17 = sshll.u32 %s255_s26, 4  ;;  %s1587_s17 = int_to_ptr.vmem [resolvable:$true] %s265_s17 }
  0x4f   : > { %p1138_p3 = scmp.ne.s32.totalorder %s1790_s4, %s1137_s20  ;;  %p1144_p13 = scmp.lt.u32.totalorder %s1137_s20, %s1790_s4 }
  0x50   : > { %p1139_p4 = pneg %p1576_p2 }
  0x52   : > { %p1140_p6 = pnand %p1139_p4, %p1138_p3 }
  0x54   : > { %p1141_p9 = pneg %p1140_p6 }
  0x56   : > { %p1146_p12 = pnand %p1144_p13, %p1141_p9 }
  0x58   : > { %1149 = shalt.err (!%p1146_p12)
}
  0x59   : > { %s1150_s26 = scalar_lea.vmem %s1570_s30, 512  ;;  %p1158_p5 = scmp.lt.s32.totalorder %s1570_s30, %s1570_s30 }
  0x5a   : > { %p1151_p1 = scmp.ne.s32.totalorder %s1570_s30, %s1150_s26  ;;  %p1159_p0 = scmp.lt.s32.totalorder %s1150_s26, %s1150_s26 }
  0x5c   : > { %p1153_p11 = pnand %p1151_p1, %p1139_p4  ;;  %p1160_p8 = por %p1159_p0, %p1158_p5 }
  0x5e   : > { %p1154_p7 = pneg %p1153_p11 }
  0x60   : > { %p1161_p10 = pnand %p1160_p8, %p1154_p7 }
  0x62   : > { %1164 = shalt.err (!%p1161_p10)
}
  0x63   : > { %s1359_s18 = smov 128   ;;  %s1360_s20 = smov 8  }
  0x64   : > { %984 = dma.hbm_to_vmem [thread:$0]  (!%p1576_p2), %s1790_s4, 512, %s1570_s30, [#allocation13], %s1359_s18, %s1359_s18, %s1360_s20  }
  0x65   : > { %s1838_s10 = sand.u32 1, %s1335_s23   ;;  %s1165_s7 = scalar_lea.hbm %s1584_s1, 128 }
  0x66   : > { %s252_s27 = scalar_lea.sflag [#allocation7], %s1838_s10  ;;  %p1166_p8 = scmp.ne.s32.totalorder %s1584_s1, %s1165_s7 }
  0x67   : > { %p1839_p10 = scmp.ne.s32.totalorder %s1830_s14, 0  ;;  %s1170_s12 = scalar_lea.hbm %s1786_s0, 1024 }
  0x68   : > { %p1171_p7 = scmp.lt.u32.totalorder %s1584_s1, %s1786_s0  ;;  %p1172_p11 = scmp.lt.u32.totalorder %s1170_s12, %s1165_s7 }
  0x69   : > { %p1168_p1 = pnand %p1166_p8, %p1839_p10  ;;  %p1174_p3 = scmp.lt.u32.totalorder %s1165_s7, %s1584_s1 }
  0x6a   : > { %p1173_p0 = por %p1172_p11, %p1171_p7 }
  0x6b   : > { %p1169_p5 = pneg %p1168_p1 }
  0x6c   : > { %p1175_p4 = por %p1174_p3, %p1173_p0 }
  0x6e   : > { %p1176_p2 = pnand %p1175_p4, %p1169_p5 }
  0x70   : > { %1179 = shalt.err (!%p1176_p2)
}
  0x71   : > { %s1180_s30 = scalar_lea.vmem %s1587_s17, 128  ;;  %s1361_s28 = smov [#allocation6]  }
  0x72   : > { %p1181_p6 = scmp.ne.s32.totalorder %s1587_s17, %s1180_s30  ;;  %s1185_s15 = sshll.u32 %s1361_s28, 4  ;;  %s1186_s15 = int_to_ptr.vmem [resolvable:$false] %s1185_s15 }
  0x73   : > { %s1187_s3 = scalar_lea.vmem %s1186_s15, 256  ;;  %p1188_p12 = scmp.lt.s32.totalorder %s1587_s17, %s1186_s15 }
  0x74   : > { %p1183_p9 = pnand %p1181_p6, %p1839_p10  ;;  %p1189_p8 = scmp.lt.s32.totalorder %s1187_s3, %s1180_s30 }
  0x76   : > { %p1184_p13 = pneg %p1183_p9  ;;  %p1190_p1 = por %p1189_p8, %p1188_p12 }
  0x78   : > { %p1191_p7 = pnand %p1190_p1, %p1184_p13 }
  0x7a   : > { %1194 = shalt.err (!%p1191_p7)
}
  0x7b   : > { %p1840_p5 = scmp.ne.s32.totalorder %s1828_s5, 0  ;;  %s1637_s18 = scalar_lea.hbm %s1788_s2, %s1488_s29 }
  0x7c   : > { %s297_s20 = scalar_lea.vmem [#allocation11], %s1479_s13  ;;  %s1195_s21 = scalar_lea.hbm %s1637_s18, 128 }
  0x7d   : > { %988 = dma.hbm_to_vmem [thread:$0]  (!%p1840_p5), %s1584_s1, 128, %s1587_s17, %s252_s27  }
  0x7e   : > { %s307_s16 = sshll.u32 %s297_s20, 4  ;;  %p1196_p11 = scmp.ne.s32.totalorder %s1637_s18, %s1195_s21  ;;  %s308_s16 = int_to_ptr.vmem [resolvable:$true] %s307_s16 }
  0x7f   : > { %s1200_s1 = scalar_lea.hbm %s1788_s2, 1024  ;;  %p1201_p4 = scmp.lt.u32.totalorder %s1637_s18, %s1788_s2 }
  0x80   : > { %p1198_p0 = pnand %p1196_p11, %p1839_p10  ;;  %p1202_p2 = scmp.lt.u32.totalorder %s1200_s1, %s1195_s21 }
  0x81   : > { %p1204_p9 = scmp.lt.u32.totalorder %s1195_s21, %s1637_s18 }
  0x82   : > { %p1199_p3 = pneg %p1198_p0  ;;  %p1203_p6 = por %p1202_p2, %p1201_p4 }
  0x84   : > { %p1205_p13 = por %p1204_p9, %p1203_p6 }
  0x86   : > { %p1206_p12 = pnand %p1205_p13, %p1199_p3 }
  0x88   : > { %1209 = shalt.err (!%p1206_p12)
}
  0x89   : > { %s1210_s29 = scalar_lea.vmem %s308_s16, 128  ;;  %s1362_s13 = smov [#allocation11]  }
  0x8a   : > { %p1211_p8 = scmp.ne.s32.totalorder %s308_s16, %s1210_s29  ;;  %s1215_s26 = sshll.u32 %s1362_s13, 4  ;;  %s1216_s26 = int_to_ptr.vmem [resolvable:$false] %s1215_s26 }
  0x8b   : > { %s1217_s30 = scalar_lea.vmem %s1216_s26, 256  ;;  %p1218_p11 = scmp.lt.s32.totalorder %s308_s16, %s1216_s26 }
  0x8c   : > { %p1213_p1 = pnand %p1211_p8, %p1839_p10  ;;  %p1219_p0 = scmp.lt.s32.totalorder %s1217_s30, %s1210_s29 }
  0x8e   : > { %p1214_p7 = pneg %p1213_p1  ;;  %p1220_p5 = por %p1219_p0, %p1218_p11 }
  0x90   : > { %p1221_p2 = pnand %p1220_p5, %p1214_p7 }
  0x92   : > { %1224 = shalt.err (!%p1221_p2)
}
  0x93   : > { %p1841_p4 = scmp.ne.s32.totalorder %s1828_s5, 0  ;;  %p1842_p3 = scmp.ne.s32.totalorder %s1836_s9, 0 }
  0x94   : > { %s331_s14 = sand.u32 (!%p1842_p3), 1, %s1331_s22   ;;  %p1843_p10 = scmp.ne.s32.totalorder (!%p1842_p3), %s1831_s6, 0 }
  0x95   : > { %994 = dma.hbm_to_vmem [thread:$0]  (!%p1841_p4), %s1637_s18, 128, %s308_s16, %s1508_s8  }
  0x96   : > { %329 = sbr.rel (%p1842_p3) target bundleno = 1232 (0x4d0), region = 40  ;;  %s1661_s28 = sshll.u32 (!%p1842_p3), %s331_s14, 3 }
  0x97   : > { %s332_s15 = scalar_lea.sflag (!%p1842_p3), [#allocation7], %s331_s14  ;;  %s335_s3 = scalar_lea.vmem (!%p1842_p3), [#allocation6], %s1661_s28 }
  0x9d   : > { %1298 = dma.done.wait (%p1843_p10), %s332_s15, 128  }
  0x9e   : > { %1300 = vsyncadd (%p1843_p10), %s332_s15, 4294967168  ;;  %s340_s5 = sand.u32 1, %s1539_s11   ;;  %s344_s9 = scalar_lea.vmem [#allocation9], %s1661_s28 }
  0x9f   : > { %s341_s8 = scalar_lea.sflag [#allocation10], %s340_s5 }
  0xa0   : > { %1302 = dma.done.wait (%p1843_p10), %s341_s8, 256  }
  0xa1   : > { %1304 = vsyncadd (%p1843_p10), %s341_s8, 4294967040  ;;  %s353_s24 = scalar_lea.vmem [#allocation11], %s1661_s28  ;;  %p1844_p5 = scmp.eq.s32.totalorder %s1539_s11, 0 }
  0xa3   : > { %1306 = dma.done.wait (%p1844_p5), [#allocation13], 512   ;;  %p1845_p6 = pmov %p1844_p5 }
  0xa4   : > { %s1846_s12 = sld [smem:[#allocation21_spill]]  ;;  %s401_s18 = sand.u32 1, %s1319_s19   ;;  %vm420_vm0 = vcmask 7168   ;;  %v1363_v0 = vmov 0.0   ;;  %vm423_vm1 = vcmask 64512  }
  0xa5   : > { %1308 = vsyncadd (%p1845_p6), [#allocation13], 4294966784  ;;  %p404_p9 = scmp.lt.s32.totalorder %s1343_s25, 1  ;;  %s1683_s20 = sshll.u32 %s401_s18, 3  ;;  %422 = vst.msk [vmem:[#allocation3] sm:$0xff] %vm420_vm0, %v1363_v0 }
  0xa6   : > { %v1364_v1 = vmov -1e+30   ;;  %424 = vst.msk [vmem:[#allocation4] sm:$0xff] %vm423_vm1, %v1363_v0  ;;  %s1847_s10 = sld [smem:[#allocation32_spill]]  ;;  %s403_s1 = scalar_lea.vmem [#allocation14], %s1683_s20 }
  0xa7   : > { %421 = vst.msk [vmem:[#allocation2] sm:$0xff] %vm420_vm0, %v1364_v1  ;;  %s405_s11 = scalar_select %p404_p9, %s1343_s25, 1 }
  0xa9   : > { %s934_s6 = sshll.u32 %s405_s11, 1 }
  0xaa   : > { %p425_p13 = scmp.eq.s32.totalorder %s1846_s12, 0 }
  0xab   : > { %vm430_vm2 = vcmask (%p425_p13), 261120   ;;  %v1365_v2 = vmov (%p425_p13), 0.0  }
  0xac   : > { %s413_s7 = scalar_lea.vmem %s1847_s10, %s934_s6  ;;  %429 = sbr.rel (!%p425_p13) target bundleno = 179 (0xb3), region = 64  ;;  %431 = vst.msk [vmem:[#allocation5] sm:$0xff] (%p425_p13), %vm430_vm2, %v1365_v2 }
  0xb3 PF: > { %954 = vmatprep.subr.mxu0 %v1363_v0  ;;  %v433_v3 = vld [vmem:[%s344_s9] sm:$0xff]  ;;  %959 = vmatprep.subr.mxu1 %v1363_v0  ;;  %vm1366_vm3 = vmmov 0   ;;  %v432_v4 = vld [vmem:[%s335_s3] sm:$0xff]  ;;  %v1367_v5 = vmov 0   ;;  %s1850_s17 = sld [smem:[#allocation21_spill]]  ;;  %vm719_vm7 = vcmask 261120  }
  0xb4   : > { %955 = vmatpush3.xpose.msk.msra.mxu0 %vm423_vm1, %v433_v3  ;;  %956 = vmatprep.mubr.msk.f32.mxu0 %vm1366_vm3, %v1363_v0  ;;  %v512_v6 = vld [vmem:[%s413_s7] sm:$0x3]  ;;  %v535_v29 = vld [vmem:[#allocation3] sm:$0xff]  ;;  %v543_v36 = vld [vmem:[#allocation4] sm:$0xff] }
  0xb5   : > { %961 = vmatprep.mubr.msk.f32.mxu1 %vm1366_vm3, %v1363_v0  ;;  %1099 = vset.pattern.permute.xlu0 %v1367_v5  ;;  %vm513_vm4 = vnez %v512_v6  ;;  %v518_v15 = vld [vmem:[#allocation2] sm:$0xff]  ;;  %v641_v45 = vld [vmem:[#allocation5] sm:$0xff] }
  0xb6   : > { %1100 = vset.pattern.permute.xlu1 %v1367_v5  ;;  %v514_v7 = vsel %vm513_vm4, 16843009, %v1367_v5  ;;  %v550_v19 = vld [vmem:[%s353_s24] sm:$0xff] }
  0xb7   : > { %957 = vmatmul.mubr.msk.f32.vlgmr.msra.gmra.mrb[0].mxu0 %vm423_vm1, %v432_v4  ;;  %v515_v8 = vunpack.c.0.s8 %v514_v7  ;;  %960 = vmatpush3.msra.mxu1 %v550_v19 }
  0xb8   : > { %964 = vmatprep.subr.mxu1 %v1363_v0 }
  0xb9   : > { %vm1700_vm5 = vcmp.ne.s32.totalorder %v515_v8, 0  ;;  %s939_s27 = sshll.u32 %s1850_s17, 3  ;;  %p721_p12 = scmp.eq.s32.totalorder %s1850_s17, 3 }
  0xba   : > { %s643_s29 = scalar_lea.vmem [#allocation12], %s939_s27 }
  0xbb   : > { %v644_v28 = vld [vmem:[%s643_s29] sm:$0xff] }
 0x18a   : > { %v507_v9 = vpop.f32.mrb[0].mxu0 }
 0x18b   : > { %v511_v11 = vmul.f32 0.35355338, %v507_v9  ;;  %v958_v12 = vpop.f32.mrb[1].mxu0 }
 0x18d   : > { %v517_v13 = vsel %vm1700_vm5, -1e+30, %v511_v11 }
 0x18e   : > { %v519_v14 = vsel %vm423_vm1, %v517_v13, -inf }
 0x18f   : > { %520 = vmax.xlane.f32.xlu0 %v519_v14 }
 0x21c   : > { %v521_v16 = vpop.xlane.xlu0 %520 }
 0x21d   : > { %v522_v17 = vmax.f32 %v518_v15, %v521_v16 }
 0x21f   : > { %v523_v18 = vsub.f32 %v518_v15, %v522_v17  ;;  %626 = vst.msk [vmem:[#allocation2] sm:$0xff] %vm420_vm0, %v522_v17  ;;  %528 = vperm.xlu0 %1099, %v522_v17  }
 0x221   : > { %v524_v26 = vmul.f32 1.442695, %v523_v18 }
 0x29e   : > { %v529_v20 = vpop.permute.xlu0 %528 }
 0x29f   : > { %v531_v21 = vsub.f32 %v517_v13, %v529_v20 }
 0x2a1   : > { %v532_v22 = vmul.f32 1.442695, %v531_v21 }
 0x2a3   : > { %1101 = vpow2.f32 %v532_v22 }
 0x2a4   : > { %1103 = vpow2.f32 %v524_v26 }
 0x2ad   : > { %v1102_v23 = vpop.eup %1101 }
 0x2ae   : > { %v534_v24 = vsel %vm1700_vm5, 0.0, %v1102_v23  ;;  %v1104_v27 = vpop.eup %1103 }
 0x2af   : > { %962 = vmatmul.mubr.msk.f32.vlgmr.msra.gmra.mrb[0].mxu1 %vm423_vm1, %v534_v24  ;;  %v537_v25 = vsel %vm423_vm1, %v534_v24, 0.0  ;;  %v536_v30 = vmul.f32 %v1104_v27, %v535_v29 }
 0x2b0   : > { %538 = vadd.xlane.f32.xlu1 %v537_v25  ;;  %966 = vmatprep.mubr.msk.f32.mxu1 %vm1366_vm3, %v1363_v0 }
 0x2b1   : > { %965 = vmatpush3.msra.mxu1 %v644_v28 }
 0x2c1   : > { %546 = vperm.xlu1 %1100, %v1104_v27  }
 0x33d   : > { %v539_v31 = vpop.xlane.xlu1 %538 }
 0x33e   : > { %v540_v32 = vadd.f32 %v539_v31, %v536_v30 }
 0x340   : > { %542 = vst.msk [vmem:[#allocation3] sm:$0xff] %vm420_vm0, %v540_v32 }
 0x341   : > { %v547_v37 = vpop.permute.xlu1 %546 }
 0x342   : > { %v549_v38 = vmul.f32 %v547_v37, %v543_v36 }
 0x347   : > { %v630_v33 = vld [vmem:[#allocation3] sm:$0xff] }
 0x348   : > { %1105 = vrcp.f32 %v630_v33  ;;  %vm632_vm6 = vcmp.gt.f32.partialorder %v630_v33, 0.0 }
 0x352   : > { %v1106_v34 = vpop.eup %1105 }
 0x353   : > { %v633_v35 = vsel %vm632_vm6, %v1106_v34, 0.0 }
 0x354   : > { %637 = vperm.xlu1 %1100, %v633_v35  }
 0x382   : > { %v620_v39 = vpop.f32.mrb[0].mxu1 }
 0x383   : > { %v624_v40 = vadd.f32 %v620_v39, %v549_v38  ;;  %v963_v41 = vpop.f32.mrb[1].mxu1 }
 0x385   : > { %625 = vst.msk [vmem:[#allocation4] sm:$0xff] %vm423_vm1, %v624_v40 }
 0x38c   : > { %v634_v42 = vld [vmem:[#allocation4] sm:$0xff] }
 0x3d3   : > { %v638_v43 = vpop.permute.xlu1 %637 }
 0x3d4   : > { %v640_v44 = vmul.f32 %v638_v43, %v634_v42 }
 0x3d6   : > { %967 = vmatmul.mubr.msk.f32.vlgmr.msra.gmra.mrb[2].mxu1 %vm423_vm1, %v640_v44 }
 0x4a6   : > { %725 = sbr.rel (!%p721_p12) target bundleno = 1205 (0x4b5), region = 72 }
 0x4a9   : > { %v714_v46 = vpop.f32.mrb[2].mxu1 }
 0x4aa   : > { %v718_v47 = vadd.f32 %v714_v46, %v641_v45  ;;  %v968_v48 = vpop.f32.mrb[3].mxu1 }
 0x4ac   : > { %720 = vst.msk [vmem:[#allocation5] sm:$0xff] %vm719_vm7, %v718_v47 }
 0x4b3   : > { %v726_v49 = vld [vmem:[#allocation5] sm:$0xff] }
 0x4b4   : > { %728 = vst.msk [vmem:[%s403_s1] sm:$0xff] %vm719_vm7, %v726_v49 }
 0x4b5 PF: > { %s1851_s13 = sld [smem:[#allocation29_spill]]  ;;  %s943_s26 = sshll.u32 %s1343_s25, 7 }
 0x4b6   : > { %s1852_s28 = sld [smem:[#allocation33_spill]]  ;;  %s744_s5 = sshll.u32 %s403_s1, 4  ;;  %s745_s5 = int_to_ptr.vmem [resolvable:$true] %s744_s5 }
 0x4b7   : > { %s730_s8 = scalar_lea.sflag [#allocation8], %s401_s18  ;;  %s1225_s9 = scalar_lea.vmem %s745_s5, 128 }
 0x4b8   : > { %p1226_p8 = scmp.ne.s32.totalorder %s745_s5, %s1225_s9  ;;  %s1368_s24 = smov [#allocation14]  }
 0x4b9   : > { %s1229_s12 = sshll.u32 %s1368_s24, 4  ;;  %s1230_s12 = int_to_ptr.vmem [resolvable:$false] %s1229_s12 }
 0x4ba   : > { %s1231_s11 = scalar_lea.vmem %s1230_s12, 256  ;;  %p1232_p0 = scmp.lt.s32.totalorder %s745_s5, %s1230_s12 }
 0x4bb   : > { %p1854_p1 = scmp.ne.s32.totalorder %s1851_s13, 0  ;;  %p1233_p2 = scmp.lt.s32.totalorder %s1231_s11, %s1225_s9 }
 0x4bc   : > { %s1853_s15 = smov %s1852_s28  ;;  %s1726_s3 = scalar_lea.hbm %s1852_s28, %s943_s26 }
 0x4bd   : > { %p1227_p7 = pnand %p1226_p8, %p1854_p1  ;;  %p1234_p4 = por %p1233_p2, %p1232_p0 }
 0x4bf   : > { %p1228_p11 = pneg %p1227_p7 }
 0x4c1   : > { %p1235_p3 = pnand %p1234_p4, %p1228_p11 }
 0x4c3   : > { %1238 = shalt.err (!%p1235_p3)
}
 0x4c4   : > { %s1239_s25 = scalar_lea.hbm %s1726_s3, 128  ;;  %s1243_s6 = scalar_lea.hbm %s1853_s15, 256 }
 0x4c5   : > { %p1240_p10 = scmp.ne.s32.totalorder %s1726_s3, %s1239_s25  ;;  %p1244_p9 = scmp.lt.u32.totalorder %s1726_s3, %s1853_s15 }
 0x4c6   : > { %p1245_p13 = scmp.lt.u32.totalorder %s1243_s6, %s1239_s25  ;;  %p1247_p8 = scmp.lt.u32.totalorder %s1239_s25, %s1726_s3 }
 0x4c7   : > { %p1241_p5 = pnand %p1240_p10, %p1854_p1 }
 0x4c8   : > { %p1246_p12 = por %p1245_p13, %p1244_p9 }
 0x4c9   : > { %p1242_p6 = pneg %p1241_p5 }
 0x4ca   : > { %p1248_p7 = por %p1247_p8, %p1246_p12 }
 0x4cc   : > { %p1249_p11 = pnand %p1248_p7, %p1242_p6 }
 0x4ce   : > { %1252 = shalt.err (!%p1249_p11)
}
 0x4cf   : > { %979 = dma.vmem_to_hbm [thread:$0]  (%p1854_p1), %s745_s5, 128, %s1726_s3, %s730_s8  }
 0x4d0 PF: > { %s1855_s10 = sld [smem:[#allocation24_spill]]  ;;  %s1856_s7 = sld [smem:[#allocation19_spill]] }
 0x4d1   : > { %s1857_s1 = sld [smem:[#allocation30_spill]] }
 0x4d6   : > { %p1002_p0 = scmp.ge.s32.totalorder %s1855_s10, 2  ;;  %s756_s17 = sand.u32 1, %s1856_s7  }
 0x4d7   : > { %p1858_p2 = scmp.ne.s32.totalorder %s1857_s1, 0  ;;  %s757_s27 = scalar_lea.sflag [#allocation8], %s756_s17 }
 0x4d9   : > { %p996_p4 = pnand %p1002_p0, %p1858_p2 }
 0x4db   : > { %1310 = dma.done.wait (!%p996_p4), %s757_s27, 128  }
 0x4dc   : > { %1312 = vsyncadd (!%p996_p4), %s757_s27, 4294967168  ;;  %s25_s28 = sadd.s32 1, %s1855_s10   ;;  %s1859_s29 = sld [smem:[#allocation20_spill]] }
 0x4dd   : > { %p22_p3 = scmp.ge.s32.totalorder %s25_s28, 10   ;;  %s1860_s20 = sld [smem:[#allocation27_spill]] }
 0x4de   : > { %s1861_s13 = sld [smem:[#allocation28_spill]]  ;;  %s1862_s24 = sld [smem:[#allocation22_spill]] }
 0x4df   : > { %s1863_s25 = sld [smem:[#allocation23_spill]]  ;;  %s1864_s26 = sld [smem:[#allocation25_spill]] }
 0x4e0   : > { %s1865_s27 = sld [smem:[#allocation26_spill]]  ;;  %s1866_s18 = smov %s1319_s19 }
 0x4e1   : > { %s1868_s21 = smov %s1331_s22  ;;  %s1869_s22 = smov %s1335_s23 }
 0x4e2   : > { %s1867_s19 = smov %s1859_s29  ;;  %24 = sbr.rel (!%p22_p3) target bundleno = 16 (0x10), region = 133 }
 0x4e4   : > { %s1870_s23 = smov %s1861_s13 }
 0x4e9   :  { %762 = vsyncpa [#allocation7], 1 }
 0x4ea   :  { %764 = vsyncpa [#allocation7 + $0x1], 1 }
 0x4eb   :  { %765 = vsyncpa [#allocation10], 1 }
 0x4ec   :  { %767 = vsyncpa [#allocation10 + $0x1], 1 }
 0x4ed   :  { %768 = vsyncpa [#allocation13], 1 }
 0x4ee   :  { %769 = vsyncpa [#allocation8], 1 }
 0x4ef   :  { %771 = vsyncpa [#allocation8 + $0x1], 1 }

</bundles_post_ra>
